<compile_context>
chip_gen: v5e
topology: v5e:2x2
jax: 0.10.0
libtpu: 0.0.40
codegen_flags: <defaults>
</compile_context>

<pallas_src>
import jax
import jax.numpy as jnp
from jax.experimental import pallas as pl
from jax.experimental.pallas import tpu as pltpu


# ---------------------------------------------------------------------------
# Fused kernel: grid = (batch_tile, layer).  The output block doubles as the
# resident activation buffer (its block index is constant along the layer axis).
# ---------------------------------------------------------------------------
def _mida_fused_kernel(x_ref, w_ref, b_ref, o_ref):
    l = pl.program_id(1)

    # Layer 0: load the (padded) input into the resident activation block.
    @pl.when(l == 0)
    def _():
        o_ref[...] = x_ref[...]

    act = o_ref[...]                                   # (TB, Dpad) f32
    w = w_ref[0]                                       # (Dpad, Dpad), f32 or bf16
    y = jnp.dot(act.astype(w.dtype), w,
                preferred_element_type=jnp.float32)    # MXU, f32 accumulate
    y = y + b_ref[0]                                   # (1, Dpad) broadcast
    o_ref[...] = jnp.where(y >= 0.0, y, 0.01 * y)      # LeakyReLU (slope 0.01)


# ---------------------------------------------------------------------------
# Parameter construction (mirrors MIDA_model.__init__ layer shapes).
# ---------------------------------------------------------------------------
def mida_layer_dims(input_size, num_layers, theta=7):
    dims = []
    for i in range(num_layers):  # encoder
        dims.append((input_size + i * theta, input_size + (i + 1) * theta))
    for i in range(num_layers):  # decoder
        dims.append((input_size + (num_layers - i) * theta,
                     input_size + (num_layers - 1 - i) * theta))
    return dims


def init_mida_params(key, input_size, num_layers, theta=7):
    """Per-layer (W[in,out], b[out]) f32 params, torch.nn.Linear-style init."""
    params = []
    for (din, dout) in mida_layer_dims(input_size, num_layers, theta):
        key, kw, kb = jax.random.split(key, 3)
        bound = 1.0 / (din ** 0.5)
        w = jax.random.uniform(kw, (din, dout), jnp.float32, -bound, bound)
        b = jax.random.uniform(kb, (dout,), jnp.float32, -bound, bound)
        params.append((w, b))
    return params


def pack_mida_params(params, weight_dtype=jnp.float32):
    """Stack + zero-pad params to lane-dense [L, Dpad, Dpad] / [L, 1, Dpad]."""
    dims = [(w.shape[0], w.shape[1]) for (w, _) in params]
    dmax = max(max(d) for d in dims)
    dpad = max(128, ((dmax + 127) // 128) * 128)
    L = len(params)
    w_stack = jnp.zeros((L, dpad, dpad), weight_dtype)
    b_stack = jnp.zeros((L, 1, dpad), jnp.float32)
    for l, (w, b) in enumerate(params):
        din, dout = w.shape
        w_stack = w_stack.at[l, :din, :dout].set(w.astype(weight_dtype))
        b_stack = b_stack.at[l, 0, :dout].set(b.astype(jnp.float32))
    out_dim = dims[-1][1]
    return w_stack, b_stack, out_dim


# ---------------------------------------------------------------------------
# Forward wrapper: one fused pallas_call for the whole network.
# ---------------------------------------------------------------------------
def mida_forward(x, w_stack, b_stack, out_dim):
    B, din0 = x.shape
    L, dpad, _ = w_stack.shape

    # Pad batch to a sublane multiple and features to the common lane width.
    b_pad = ((B + 7) // 8) * 8
    xp = jnp.zeros((b_pad, dpad), jnp.float32).at[:B, :din0].set(x)

    # Batch tile: big where possible, otherwise the whole (padded) batch.
    if b_pad % 256 == 0:
        tb = 256
    elif b_pad % 128 == 0:
        tb = 128
    else:
        tb = b_pad
    nb = b_pad // tb

    w_bytes = int(w_stack.size) * w_stack.dtype.itemsize
    cost = pl.CostEstimate(
        flops=2 * b_pad * L * dpad * dpad,
        transcendentals=0,
        bytes_accessed=xp.size * 4 + w_bytes + b_stack.size * 4 + b_pad * dpad * 4,
    )

    out = pl.pallas_call(
        _mida_fused_kernel,
        out_shape=jax.ShapeDtypeStruct((b_pad, dpad), jnp.float32),
        grid_spec=pltpu.PrefetchScalarGridSpec(
            num_scalar_prefetch=0,
            grid=(nb, L),  # batch tiles (parallel) x layers (arbitrary, inner)
            in_specs=[
                pl.BlockSpec((tb, dpad), lambda bi, l: (bi, 0)),        # x (read @ l==0)
                pl.BlockSpec((1, dpad, dpad), lambda bi, l: (l, 0, 0)),  # W[l]
                pl.BlockSpec((1, 1, dpad), lambda bi, l: (l, 0, 0)),     # b[l]
            ],
            out_specs=pl.BlockSpec((tb, dpad), lambda bi, l: (bi, 0)),   # resident act
        ),
        compiler_params=pltpu.CompilerParams(
            dimension_semantics=("parallel", "arbitrary"),
        ),
        cost_estimate=cost,
    )(xp, w_stack, b_stack)

    return out[:B, :out_dim]


# ---------------------------------------------------------------------------
# Pure-JAX reference (eval-mode dropout = identity).
# ---------------------------------------------------------------------------
def mida_reference(x, params):
    for (w, b) in params:
        y = jnp.dot(x, w, precision=jax.lax.Precision.HIGHEST) + b
        x = jnp.where(y >= 0.0, y, 0.01 * y)
    return x


if __name__ == "__main__":
    input_size = 32
    num_layers = 2
    theta = 7
    batch = 8

    key = jax.random.PRNGKey(0)
    key, kx = jax.random.split(key)
    x = jax.random.normal(kx, (batch, input_size), jnp.float32)

    params = init_mida_params(key, input_size, num_layers, theta)

    # f32 weights: tight check against the pure-JAX reference.
    w_stack, b_stack, out_dim = pack_mida_params(params, weight_dtype=jnp.float32)
    out = jax.block_until_ready(mida_forward(x, w_stack, b_stack, out_dim))
    ref = mida_reference(x, params)
    assert out.shape == (batch, input_size), out.shape
    assert jnp.allclose(out, ref, atol=1e-4, rtol=1e-4)

    # bf16 weights (v6e/v7x-friendly path): run it to verify it compiles/executes.
    w16, b16, out_dim16 = pack_mida_params(params, weight_dtype=jnp.bfloat16)
    out16 = jax.block_until_ready(mida_forward(x, w16, b16, out_dim16))
    assert out16.shape == (batch, input_size)
    assert bool(jnp.all(jnp.isfinite(out16)))

    print("KERNEL_OK")
</pallas_src>

<mosaic_0001>
module attributes {stable_mosaic.version = 11 : i64} {
  func.func @_mida_fused_kernel(%arg0: i32, %arg1: i32, %arg2: memref<8x128xf32, #tpu.memory_space<vmem>>, %arg3: memref<1x128x128xf32, #tpu.memory_space<vmem>>, %arg4: memref<1x1x128xf32, #tpu.memory_space<vmem>>, %arg5: memref<8x128xf32, #tpu.memory_space<vmem>>) attributes {dimension_semantics = [#tpu.dimension_semantics<parallel>, #tpu.dimension_semantics<arbitrary>], iteration_bounds = array<i64: 1, 4>, scalar_prefetch = 0 : i64, scratch_operands = 0 : i64, tpu.core_type = #tpu.core_type<tc>, window_params = [{transform_indices = @transform_0, window_bounds = array<i64: 8, 128>}, {transform_indices = @transform_1, window_bounds = array<i64: 1, 128, 128>}, {transform_indices = @transform_2, window_bounds = array<i64: 1, 1, 128>}, {transform_indices = @transform_3, window_bounds = array<i64: 8, 128>}]} {
    %c0_i32 = arith.constant 0 : i32
    %0 = arith.cmpi eq, %arg1, %c0_i32 : i32
    %1 = arith.extui %0 : i1 to i32
    %c0_i32_0 = arith.constant 0 : i32
    %2 = arith.cmpi ne, %1, %c0_i32_0 : i32
    scf.if %2 {
      %c0_12 = arith.constant 0 : index
      %c0_13 = arith.constant 0 : index
      %17 = vector.load %arg2[%c0_12, %c0_13] : memref<8x128xf32, #tpu.memory_space<vmem>>, vector<8x128xf32>
      %c0_14 = arith.constant 0 : index
      %c0_15 = arith.constant 0 : index
      %18 = vector.load %arg5[%c0_14, %c0_15] : memref<8x128xf32, #tpu.memory_space<vmem>>, vector<8x128xf32>
      tpu.vector_store %arg5[%c0_14, %c0_15], %17 {strides = array<i32>} : memref<8x128xf32, #tpu.memory_space<vmem>>, vector<8x128xf32>,
    } else {
    }
    %c0 = arith.constant 0 : index
    %c0_1 = arith.constant 0 : index
    %3 = vector.load %arg5[%c0, %c0_1] : memref<8x128xf32, #tpu.memory_space<vmem>>, vector<8x128xf32>
    %c0_2 = arith.constant 0 : index
    %c0_3 = arith.constant 0 : index
    %c0_4 = arith.constant 0 : index
    %4 = vector.load %arg3[%c0_2, %c0_3, %c0_4] : memref<1x128x128xf32, #tpu.memory_space<vmem>>, vector<1x128x128xf32>
    %5 = vector.shape_cast %4 : vector<1x128x128xf32> to vector<128x128xf32>
    %cst = arith.constant dense<0.000000e+00> : vector<8x128xf32>
    %6 = tpu.matmul %3, %5, %cst {dimension_numbers = #tpu.dot_dimension_numbers<[1], [0], [0], [1], [0, 0, 1, 1], [], []>} : vector<8x128xf32>, vector<128x128xf32>, vector<8x128xf32> -> vector<8x128xf32>
    %c0_5 = arith.constant 0 : index
    %c0_6 = arith.constant 0 : index
    %c0_7 = arith.constant 0 : index
    %7 = vector.load %arg4[%c0_5, %c0_6, %c0_7] : memref<1x1x128xf32, #tpu.memory_space<vmem>>, vector<1x1x128xf32>
    %8 = vector.shape_cast %7 : vector<1x1x128xf32> to vector<1x128xf32>
    %9 = vector.broadcast %8 : vector<1x128xf32> to vector<8x128xf32>
    %10 = arith.addf %6, %9 : vector<8x128xf32>
    %cst_8 = arith.constant 0.000000e+00 : f32
    %11 = vector.broadcast %cst_8 : f32 to vector<8x128xf32>
    %12 = arith.cmpf oge, %10, %11 : vector<8x128xf32>
    %cst_9 = arith.constant 0.00999999977 : f32
    %13 = vector.broadcast %cst_9 : f32 to vector<8x128xf32>
    %14 = arith.mulf %13, %10 : vector<8x128xf32>
    %15 = arith.select %12, %10, %14 : vector<8x128xi1>, vector<8x128xf32>
    %c0_10 = arith.constant 0 : index
    %c0_11 = arith.constant 0 : index
    %16 = vector.load %arg5[%c0_10, %c0_11] : memref<8x128xf32, #tpu.memory_space<vmem>>, vector<8x128xf32>
    tpu.vector_store %arg5[%c0_10, %c0_11], %15 {strides = array<i32>} : memref<8x128xf32, #tpu.memory_space<vmem>>, vector<8x128xf32>,
    return
  }
  func.func @transform_0(%arg0: i32, %arg1: i32) -> (i32, i32) {
    %c0_i32 = arith.constant 0 : i32
    %c0_i32_0 = arith.constant 0 : i32
    return %arg0, %c0_i32 : i32, i32
  }
  func.func @transform_1(%arg0: i32, %arg1: i32) -> (i32, i32, i32) {
    %c0_i32 = arith.constant 0 : i32
    %c0_i32_0 = arith.constant 0 : i32
    %c0_i32_1 = arith.constant 0 : i32
    return %arg1, %c0_i32, %c0_i32_0 : i32, i32, i32
  }
  func.func @transform_2(%arg0: i32, %arg1: i32) -> (i32, i32, i32) {
    %c0_i32 = arith.constant 0 : i32
    %c0_i32_0 = arith.constant 0 : i32
    %c0_i32_1 = arith.constant 0 : i32
    return %arg1, %c0_i32, %c0_i32_0 : i32, i32, i32
  }
  func.func @transform_3(%arg0: i32, %arg1: i32) -> (i32, i32) {
    %c0_i32 = arith.constant 0 : i32
    %c0_i32_0 = arith.constant 0 : i32
    return %arg0, %c0_i32 : i32, i32
  }
}

</mosaic_0001>

<bundles_post_ra>
// kernel: tpu_custom_call.1
= control target key start
LH: loop header
LB: loop body
LE: loop exit
PB: predicated region body
PF: predicated region fallthrough
CT: control target
= control target key end

     0   :  { %8 = vsyncpa [#allocation3], 0  ;;  %s856_s0 = inlined_call_operand.hbm [shape: f32[8,128], index: 0, kind: input, shape index: {}]   ;;  %s857_s1 = inlined_call_operand.hbm [shape: f32[4,128,128], index: 1, kind: input, shape index: {}]   ;;  %s858_s2 = inlined_call_operand.hbm [shape: f32[4,1,128], index: 2, kind: input, shape index: {}]   ;;  %s859_s3 = inlined_call_operand.hbm [shape: f32[8,128], index: 3, kind: output, shape index: {}]  }
   0x1   :  { %9 = vsyncpa [#allocation6], 0 }
   0x2   :  { %11 = vsyncpa [#allocation6 + $0x1], 0 }
   0x3   :  { %12 = vsyncpa [#allocation4], 0  ;;  %s702_s12 = smov 0   ;;  %s704_s13 = smov 0  }
   0x4   :  { %s706_s14 = smov 0   ;;  %s708_s15 = smov 0  }
   0x5   :  { %s710_s16 = smov 0   ;;  %s712_s17 = smov 0  }
   0x6 LB: > { %s27_s18 = sadd.s32 1, %s672_s16  ;;  %s63_s19 = sadd.s32 1, %s664_s14  ;;  %s676_s17 = sphi %s712_s17, %s18_s17   ;;  %s672_s16 = sphi %s710_s16, %s868_s16   ;;  %s668_s15 = sphi %s708_s15, %s867_s15   ;;  %s664_s14 = sphi %s706_s14, %s866_s14   ;;  %s660_s13 = sphi %s704_s13, %s865_s13   ;;  %s656_s12 = sphi %s702_s12, %s864_s12  }
   0x7   : > { %p28_p0 = scmp.ge.s32.totalorder %s27_s18, 4  ;;  %p70_p1 = scmp.ne.s32.totalorder %s664_s14, %s660_s13 }
   0x8   : > { %p71_p2 = scmp.eq.s32.totalorder %s676_s17, 0  ;;  %p443_p4 = scmp.lt.s32.totalorder %s676_s17, 4 }
   0x9   : > { %s870_s18 = smov (%p28_p0, %s27_s18), 0  ;;  %s166_s22 = sand.u32 1, %s676_s17  }
   0xa   : > { %p739_p3 = por %p71_p2, %p70_p1  ;;  %s60_s21 = ssub.s32 %s672_s16, %s870_s18 }
   0xb   : > { %p61_p5 = scmp.eq.s32.totalorder %s60_s21, 0  ;;  %s168_s23 = sand.u32 1, %s664_s14  }
   0xc   : > { %s418_s24 = sshll.u32 %s672_s16, 7  ;;  %s407_s26 = sshll.u32 %s168_s23, 7 }
   0xd   : > { %s750_s25 = scalar_select %p61_p5, %s664_s14, %s63_s19  }
   0xe   : > { %s175_s29 = scalar_lea.hbm %s857_s1, %s418_s24  ;;  %s170_s4 = scalar_lea.vmem [#allocation5], %s407_s26 }
   0xf   : > { %s176_s30 = sshll.u32 %s175_s29, 4  ;;  %s178_s5 = sshll.u32 %s170_s4, 4  ;;  %s177_s30 = int_to_ptr.hbm [resolvable:$true] %s176_s30  ;;  %s179_s5 = int_to_ptr.vmem [resolvable:$true] %s178_s5 }
  0x10   : > { %p761_p6 = pnand %p443_p4, %p739_p3  ;;  %s167_s7 = scalar_lea.sflag [#allocation6], %s166_s22 }
  0x11   : > { %s678_s8 = smov 128   ;;  %s679_s9 = smov 8  }
  0x12   : > { %438 = dma.hbm_to_vmem [thread:$0]  (!%p761_p6), %s177_s30, 2048, %s179_s5, %s167_s7, %s678_s8, %s678_s8, %s679_s9  }
  0x13   : > { %s768_s10 = sadd.s32 4294967295, %s676_s17   ;;  %p76_p7 = scmp.ne.s32.totalorder %s660_s13, %s656_s12 }
  0x14   : > { %p77_p8 = scmp.eq.s32.totalorder %s768_s10, 0  ;;  %p404_p9 = scmp.ge.s32.totalorder %s676_s17, 1 }
  0x15   : > { %p139_p10 = scmp.lt.s32.totalorder %s676_s17, 5  ;;  %s153_s22 = sshll.u32 %s856_s0, 4  ;;  %s154_s22 = int_to_ptr.hbm [resolvable:$true] %s153_s22 }
  0x16   : > { %p777_p11 = por %p77_p8, %p76_p7  ;;  %s680_s12 = smov [#allocation2]  }
  0x17   : > { %p781_p12 = pnand %p404_p9, %p139_p10  ;;  %s155_s24 = sshll.u32 %s680_s12, 4  ;;  %s156_s24 = int_to_ptr.vmem [resolvable:$true] %s155_s24 }
  0x18   : > { %s194_s28 = scalar_lea.hbm %s858_s2, %s672_s16  ;;  %s191_s30 = scalar_lea.vmem [#allocation7], %s168_s23 }
  0x19   : > { %p431_p13 = pneg %p781_p12  ;;  %s196_s29 = sshll.u32 %s194_s28, 4  ;;  %s197_s29 = int_to_ptr.hbm [resolvable:$true] %s196_s29 }
  0x1a   : > { %s198_s4 = sshll.u32 %s191_s30, 4  ;;  %207 = sbr.rel (%p781_p12) target bundleno = 212 (0xd4), region = 32  ;;  %s199_s4 = int_to_ptr.vmem [resolvable:$true] %s198_s4 }
  0x1b   : > { %p432_p0 = pnand %p431_p13, %p77_p8 }
  0x1c   : > { %441 = dma.hbm_to_vmem [thread:$0]  (!%p761_p6), %s197_s29, 16, %s199_s4, %s167_s7  }
  0x1d   : > { %434 = dma.hbm_to_vmem [thread:$0]  (!%p432_p0), %s154_s22, 128, %s156_s24, [#allocation3]  }
  0x1f   : > { %643 = dma.done.wait (%p77_p8), [#allocation3], 128  }
  0x20   : > { %645 = vsyncadd (%p77_p8), [#allocation3], 4294967168  ;;  %s214_s5 = sand.u32 1, %s768_s10   ;;  %s216_s23 = sand.u32 1, %s660_s13  }
  0x21   : > { %s412_s8 = sshll.u32 %s216_s23, 7  ;;  %s215_s9 = scalar_lea.sflag [#allocation6], %s214_s5 }
  0x22   : > { %s808_s20 = scalar_lea.vmem [#allocation5], %s412_s8 }
  0x23   : > { %647 = dma.done.wait (%p777_p11), %s215_s9, 2064  }
  0x24   : > { %649 = vsyncadd (%p777_p11), %s215_s9, 4294965232  ;;  %s814_s6 = scalar_lea.vmem [#allocation7], %s216_s23  ;;  %p413_p1 = scmp.ne.s32.totalorder %s668_s15, 0 }
  0x26   : > { %253 = sbr.rel (%p413_p1) target bundleno = 45 (0x2d), region = 48 }
  0x2b   : > { %v254_v0 = vld [vmem:[#allocation2] sm:$0xff] }
  0x2c   : > { %255 = vst [vmem:[#allocation8] sm:$0xff] %v254_v0 }
  0x2d PF: > { %v272_v1 = vld [vmem:[%s808_s20 + $0x78] sm:$0xff]  ;;  %v271_v2 = vld [vmem:[%s808_s20 + $0x70] sm:$0xff]  ;;  %v270_v3 = vld [vmem:[%s808_s20 + $0x68] sm:$0xff]  ;;  %s681_s15 = smov [#allocation8]   ;;  %s311_s21 = sshll.u32 %s859_s3, 4  ;;  %s312_s21 = int_to_ptr.hbm [resolvable:$true] %s311_s21 }
  0x2e   : > { %277 = vmatpush.msra.mxu0 %v272_v1  ;;  %v269_v4 = vld [vmem:[%s808_s20 + $0x60] sm:$0xff]  ;;  %v268_v5 = vld [vmem:[%s808_s20 + $0x58] sm:$0xff]  ;;  %v267_v6 = vld [vmem:[%s808_s20 + $0x50] sm:$0xff]  ;;  %s309_s7 = sshll.u32 %s681_s15, 4  ;;  %p445_p2 = scmp.eq.s32.totalorder %s768_s10, 3  ;;  %s310_s7 = int_to_ptr.vmem [resolvable:$true] %s309_s7 }
  0x2f   : > { %v266_v7 = vld [vmem:[%s808_s20 + $0x48] sm:$0xff]  ;;  %v265_v8 = vld [vmem:[%s808_s20 + $0x40] sm:$0xff]  ;;  %v264_v9 = vld [vmem:[%s808_s20 + $0x38] sm:$0xff] }
  0x30   : > { %278 = vmatpush.msra.mxu0 %v271_v2  ;;  %v263_v10 = vld [vmem:[%s808_s20 + $0x30] sm:$0xff]  ;;  %v262_v11 = vld [vmem:[%s808_s20 + $0x28] sm:$0xff]  ;;  %v261_v12 = vld [vmem:[%s808_s20 + $0x20] sm:$0xff] }
  0x31   : > { %v260_v13 = vld [vmem:[%s808_s20 + $0x18] sm:$0xff]  ;;  %v259_v14 = vld [vmem:[%s808_s20 + $0x10] sm:$0xff]  ;;  %v258_v15 = vld [vmem:[%s808_s20 + $0x8] sm:$0xff] }
  0x32   : > { %279 = vmatpush.msra.mxu0 %v270_v3  ;;  %v257_v16 = vld [vmem:[%s808_s20] sm:$0xff]  ;;  %v499_v18 = vld [vmem:[%s814_s6] ss:$0 sm:$0xff] }
  0x33   : > { %v256_v17 = vld [vmem:[#allocation8] sm:$0xff] }
  0x34   : > { %280 = vmatpush.msra.mxu0 %v269_v4 }
  0x36   : > { %281 = vmatpush.msra.mxu0 %v268_v5 }
  0x38   : > { %282 = vmatpush.msra.mxu0 %v267_v6 }
  0x3a   : > { %283 = vmatpush.msra.mxu0 %v266_v7 }
  0x3c   : > { %284 = vmatpush.msra.mxu0 %v265_v8 }
  0x3e   : > { %285 = vmatpush.msra.mxu0 %v264_v9 }
  0x40   : > { %286 = vmatpush.msra.mxu0 %v263_v10 }
  0x42   : > { %287 = vmatpush.msra.mxu0 %v262_v11 }
  0x44   : > { %288 = vmatpush.msra.mxu0 %v261_v12 }
  0x46   : > { %289 = vmatpush.msra.mxu0 %v260_v13 }
  0x48   : > { %290 = vmatpush.msra.mxu0 %v259_v14 }
  0x4a   : > { %291 = vmatpush.msra.mxu0 %v258_v15 }
  0x4c   : > { %292 = vmatpush.msra.mxu0 %v257_v16 }
  0x4d   : > { %293 = vmatmul.f32.vlgmr.msra.gmra.mxu0 %v256_v17 }
  0xca   : > { %v294_v19 = vpop.f32.mrf.mxu0 }
  0xcb   : > { %v295_v20 = vadd.f32 %v499_v18, %v294_v19 }
  0xcd   : > { %vm297_vm0 = vcmp.ge.f32.partialorder %v295_v20, 0.0  ;;  %v298_v21 = vmul.f32 0.01, %v295_v20 }
  0xcf   : > { %v299_v22 = vsel %vm297_vm0, %v295_v20, %v298_v21 }
  0xd0   : > { %300 = vst [vmem:[#allocation8] sm:$0xff] %v299_v22 }
  0xd1   : > { %428 = dma.vmem_to_hbm [thread:$0]  (%p445_p2), %s310_s7, 128, %s312_s21, [#allocation4]  }
  0xd2   : > { %651 = dma.done.wait (%p445_p2), [#allocation4], 128  }
  0xd3   : > { %653 = vsyncadd (%p445_p2), [#allocation4], 4294967168 }
  0xd4 PF: > { %s18_s17 = sadd.s32 1, %s676_s17   ;;  %s864_s12 = smov %s660_s13 }
  0xd5   : > { %p15_p3 = scmp.ge.s32.totalorder %s18_s17, 6   ;;  %s865_s13 = smov %s664_s14 }
  0xd6   : > { %s866_s14 = smov %s750_s25  ;;  %s867_s15 = smov %s672_s16 }
  0xd7   : > { %s868_s16 = smov %s870_s18  ;;  %17 = sbr.rel (!%p15_p3) target bundleno = 6 (0x6), region = 91 }
  0xdc   :  { %325 = vsyncpa [#allocation3], 1 }
  0xdd   :  { %327 = vsyncpa [#allocation3 + $0x1], 1 }
  0xde   :  { %328 = vsyncpa [#allocation6], 1 }
  0xdf   :  { %330 = vsyncpa [#allocation6 + $0x1], 1 }
  0xe0   :  { %331 = vsyncpa [#allocation4], 1 }
  0xe1   :  { %333 = vsyncpa [#allocation4 + $0x1], 1 }

</bundles_post_ra>
